<compile_context>
chip_gen: v6e
topology: v6e:2x2x1
jax: 0.10.0
libtpu: 0.0.40
codegen_flags: <defaults>
</compile_context>

<pallas_src>
import functools
import math

import jax
import jax.numpy as jnp
from jax import lax
from jax.experimental import pallas as pl
from jax.experimental.pallas import tpu as pltpu


# -----------------------------------------------------------------------------
# Parameter setup (deterministic, mirrors PositionalEncoding.__init__)
# -----------------------------------------------------------------------------
def build_pe_table(d_model: int, max_len: int, dtype=jnp.float32) -> jnp.ndarray:
    position = jnp.arange(0, max_len, dtype=jnp.float32)[:, None]            # (L, 1)
    div_term = jnp.exp(
        jnp.arange(0, d_model, 2, dtype=jnp.float32) * (-math.log(10000.0) / d_model)
    )                                                                         # (D/2,)
    pe = jnp.zeros((max_len, d_model), dtype=jnp.float32)
    pe = pe.at[:, 0::2].set(jnp.sin(position * div_term))
    pe = pe.at[:, 1::2].set(jnp.cos(position * div_term[: d_model // 2]))
    return pe.astype(dtype)                                                   # (L, D)


# -----------------------------------------------------------------------------
# 32-bit mixing function (murmur/splitmix-style finalizer): good avalanche,
# only 32-bit integer VPU ops.  Used both host-side (seed premix) and in-kernel.
# -----------------------------------------------------------------------------
def _mix32(x):
    x = x ^ (x >> 16)
    x = x * jnp.uint32(0x7FEB352D)
    x = x ^ (x >> 15)
    x = x * jnp.uint32(0x846CA68B)
    x = x ^ (x >> 16)
    return x


# -----------------------------------------------------------------------------
# Pallas kernel: y = dropout(x + pe) on one (1, tile_rows, 128) lane-dense tile
# -----------------------------------------------------------------------------
def pe_dropout_kernel(key_ref, x_ref, pe_ref, o_ref, *,
                      p: float, tile_rows: int, total_rows: int):
    # x_ref/o_ref block: (1, tile_rows, C); pe_ref block: (tile_rows, C)
    y = x_ref[0].astype(jnp.float32) + pe_ref[...].astype(jnp.float32)

    if p > 0.0:  # static Python branch (training-mode dropout)
        keep = 1.0 - p
        rows, cols = y.shape
        r_tile = pl.program_id(0)
        b = pl.program_id(1)

        # Global linear element index (unique per element of the whole tensor,
        # independent of tiling) -> unique random bits per element & grid step.
        base = b * total_rows + r_tile * tile_rows                     # scalar int32
        row_ids = lax.broadcasted_iota(jnp.int32, (rows, cols), 0).astype(jnp.uint32)
        col_ids = lax.broadcasted_iota(jnp.int32, (rows, cols), 1).astype(jnp.uint32)
        g_row = base.astype(jnp.uint32) + row_ids
        lin = g_row * jnp.uint32(cols) + col_ids

        key = key_ref[0].astype(jnp.uint32)                            # host-premixed seed
        bits = _mix32(lin ^ key)

        # integer-threshold compare: keep iff bits < round(keep * 2^32)
        thresh = jnp.uint32(int(round(keep * 4294967296.0)))
        y = jnp.where(bits < thresh, y * jnp.float32(1.0 / keep), jnp.float32(0.0))

    o_ref[0] = y.astype(o_ref.dtype)


# -----------------------------------------------------------------------------
# Tile-size picker: largest multiple-of-8 divisor of `rows` whose tile is
# <= target_bytes (~2 MiB).  Keeps ~5x block footprint well under v7x VMEM.
# -----------------------------------------------------------------------------
def _pick_tile_rows(rows: int, bytes_per_row: int, target_bytes: int = 2 << 20) -> int:
    if rows * bytes_per_row <= target_bytes or rows % 8 != 0:
        return rows  # whole extent (full array dim is always a legal block dim)
    max_rows = max(8, (target_bytes // bytes_per_row) // 8 * 8)
    best = 8
    for cand in range(8, min(rows, max_rows) + 1, 8):
        if rows % cand == 0:
            best = cand
    return best


# -----------------------------------------------------------------------------
# Wrapper
# -----------------------------------------------------------------------------
def positional_encoding_forward(x, pe, seed, *, p: float = 0.1, training: bool = True):
    B, S, D = x.shape
    assert pe.shape == (S, D), "exact PyTorch semantics require seq == max_len"
    pe = pe.astype(x.dtype)

    # Lane-dense flatten: present a 128-wide last dim whenever possible.
    if (S * D) % 128 == 0:
        cols = 128
        rows = (S * D) // 128
    else:
        cols = D           # fallback: whole (S, D) slab per batch element
        rows = S
    x_r = x.reshape(B, rows, cols)
    pe_r = pe.reshape(rows, cols)

    bytes_per_row = cols * jnp.dtype(x.dtype).itemsize
    tile_rows = _pick_tile_rows(rows, bytes_per_row)
    n_row_tiles = rows // tile_rows

    # Pre-mix the seed on the host so the kernel needs a single hash round.
    key = _mix32(
        jnp.asarray(seed, jnp.uint32).reshape(-1)[:1] ^ jnp.uint32(0x9E3779B9)
    ).astype(jnp.int32)                                                  # (1,) int32

    kernel = functools.partial(
        pe_dropout_kernel,
        p=(float(p) if training else 0.0),
        tile_rows=tile_rows,
        total_rows=rows,
    )

    grid_spec = pltpu.PrefetchScalarGridSpec(
        num_scalar_prefetch=1,                        # mixed seed lands in SMEM
        grid=(n_row_tiles, B),                        # batch innermost: pe tile stays resident
        in_specs=[
            pl.BlockSpec((1, tile_rows, cols), lambda r, b, key_ref: (b, r, 0)),  # x
            pl.BlockSpec((tile_rows, cols), lambda r, b, key_ref: (r, 0)),        # pe (shared)
        ],
        out_specs=pl.BlockSpec((1, tile_rows, cols), lambda r, b, key_ref: (b, r, 0)),
    )

    out = pl.pallas_call(
        kernel,
        out_shape=jax.ShapeDtypeStruct((B, rows, cols), x.dtype),
        grid_spec=grid_spec,
        compiler_params=pltpu.CompilerParams(
            dimension_semantics=("parallel", "parallel"),   # megacore sharding on v7x
            vmem_limit_bytes=32 * 1024 * 1024,
        ),
    )(key, x_r, pe_r)

    return out.reshape(B, S, D)


# -----------------------------------------------------------------------------
# Main
# -----------------------------------------------------------------------------
if __name__ == "__main__":
    d_model = 32
    max_len = 16          # seq length == max_len (required by the module's broadcast)
    batch = 2
    dropout_p = 0.1

    rng = jax.random.PRNGKey(0)
    x = jax.random.normal(rng, (batch, max_len, d_model), dtype=jnp.float32)

    pe = build_pe_table(d_model, max_len)                      # (S, D)
    seed = jnp.array([0], dtype=jnp.int32)

    # training-mode path (dropout active)
    out_train = positional_encoding_forward(x, pe, seed, p=dropout_p, training=True)
    out_train = jax.block_until_ready(out_train)
    assert out_train.shape == x.shape and out_train.dtype == x.dtype

    ref = x + pe[None, :, :]

    # eval-mode path (dropout == identity) must match plain JAX add
    out_eval = positional_encoding_forward(x, pe, seed, p=dropout_p, training=False)
    out_eval = jax.block_until_ready(out_eval)
    assert jnp.allclose(out_eval, ref, atol=1e-6)

    # inverted-dropout invariant: every element is either 0 (dropped) or ref/keep
    keep = 1.0 - dropout_p
    kept_ok = jnp.isclose(out_train * keep, ref, atol=1e-5)
    dropped = out_train == 0.0
    assert bool(jnp.all(kept_ok | dropped))

    print("KERNEL_OK")
</pallas_src>

<mosaic_0001>
module attributes {stable_mosaic.version = 11 : i64} {
  func.func @pe_dropout_kernel(%arg0: i32, %arg1: i32, %arg2: memref<1xi32, #tpu.memory_space<smem>>, %arg3: memref<1x4x128xf32, #tpu.memory_space<vmem>>, %arg4: memref<4x128xf32, #tpu.memory_space<vmem>>, %arg5: memref<1x4x128xf32, #tpu.memory_space<vmem>>) attributes {dimension_semantics = [#tpu.dimension_semantics<parallel>, #tpu.dimension_semantics<parallel>], iteration_bounds = array<i64: 1, 2>, scalar_prefetch = 1 : i64, scratch_operands = 0 : i64, tpu.core_type = #tpu.core_type<tc>, window_params = [{transform_indices = @transform_0, window_bounds = array<i64: 1, 4, 128>}, {transform_indices = @transform_1, window_bounds = array<i64: 4, 128>}, {transform_indices = @transform_2, window_bounds = array<i64: 1, 4, 128>}]} {
    %c0 = arith.constant 0 : index
    %c0_0 = arith.constant 0 : index
    %c0_1 = arith.constant 0 : index
    %0 = vector.load %arg3[%c0, %c0_0, %c0_1] : memref<1x4x128xf32, #tpu.memory_space<vmem>>, vector<1x4x128xf32>
    %1 = vector.shape_cast %0 : vector<1x4x128xf32> to vector<4x128xf32>
    %c0_2 = arith.constant 0 : index
    %c0_3 = arith.constant 0 : index
    %2 = vector.load %arg4[%c0_2, %c0_3] : memref<4x128xf32, #tpu.memory_space<vmem>>, vector<4x128xf32>
    %3 = arith.addf %1, %2 : vector<4x128xf32>
    %c4_i32 = arith.constant 4 : i32
    %4 = arith.muli %arg1, %c4_i32 : i32
    %c4_i32_4 = arith.constant 4 : i32
    %5 = arith.muli %arg0, %c4_i32_4 : i32
    %6 = arith.addi %4, %5 : i32
    %7 = tpu.iota {dimensions = array<i32: 0>} : vector<4x128xi32>
    %8 = tpu.iota {dimensions = array<i32: 1>} : vector<4x128xi32>
    %9 = vector.broadcast %6 : i32 to vector<4x128xi32>
    %10 = arith.addi %9, %7 : vector<4x128xi32>
    %c128_i32 = arith.constant 128 : i32
    %11 = vector.broadcast %c128_i32 : i32 to vector<4x128xi32>
    %12 = arith.muli %10, %11 : vector<4x128xi32>
    %13 = arith.addi %12, %8 : vector<4x128xi32>
    %c0_5 = arith.constant 0 : index
    %14 = memref.load %arg2[%c0_5] : memref<1xi32, #tpu.memory_space<smem>>
    %15 = vector.broadcast %14 : i32 to vector<4x128xi32>
    %16 = arith.xori %13, %15 : vector<4x128xi32>
    %c16_i32 = arith.constant 16 : i32
    %17 = vector.broadcast %c16_i32 : i32 to vector<4x128xi32>
    %18 = arith.shrui %16, %17 : vector<4x128xi32>
    %19 = arith.xori %16, %18 : vector<4x128xi32>
    %c2146121005_i32 = arith.constant 2146121005 : i32
    %20 = vector.broadcast %c2146121005_i32 : i32 to vector<4x128xi32>
    %21 = arith.muli %19, %20 : vector<4x128xi32>
    %c15_i32 = arith.constant 15 : i32
    %22 = vector.broadcast %c15_i32 : i32 to vector<4x128xi32>
    %23 = arith.shrui %21, %22 : vector<4x128xi32>
    %24 = arith.xori %21, %23 : vector<4x128xi32>
    %c-2073254261_i32 = arith.constant -2073254261 : i32
    %25 = vector.broadcast %c-2073254261_i32 : i32 to vector<4x128xi32>
    %26 = arith.muli %24, %25 : vector<4x128xi32>
    %c16_i32_6 = arith.constant 16 : i32
    %27 = vector.broadcast %c16_i32_6 : i32 to vector<4x128xi32>
    %28 = arith.shrui %26, %27 : vector<4x128xi32>
    %29 = arith.xori %26, %28 : vector<4x128xi32>
    %c-429496730_i32 = arith.constant -429496730 : i32
    %30 = vector.broadcast %c-429496730_i32 : i32 to vector<4x128xi32>
    %31 = arith.cmpi ult, %29, %30 : vector<4x128xi32>
    %cst = arith.constant 1.11111116 : f32
    %32 = vector.broadcast %cst : f32 to vector<4x128xf32>
    %33 = arith.mulf %3, %32 : vector<4x128xf32>
    %cst_7 = arith.constant 0.000000e+00 : f32
    %34 = vector.broadcast %cst_7 : f32 to vector<4x128xf32>
    %35 = arith.select %31, %33, %34 : vector<4x128xi1>, vector<4x128xf32>
    %c0_8 = arith.constant 0 : index
    %c0_9 = arith.constant 0 : index
    %c0_10 = arith.constant 0 : index
    %36 = vector.load %arg5[%c0_8, %c0_9, %c0_10] : memref<1x4x128xf32, #tpu.memory_space<vmem>>, vector<1x4x128xf32>
    %37 = vector.shape_cast %36 : vector<1x4x128xf32> to vector<4x128xf32>
    %38 = vector.shape_cast %35 : vector<4x128xf32> to vector<1x4x128xf32>
    tpu.vector_store %arg5[%c0_8, %c0_9, %c0_10], %38 {strides = array<i32>} : memref<1x4x128xf32, #tpu.memory_space<vmem>>, vector<1x4x128xf32>,
    return
  }
  func.func @transform_0(%arg0: i32, %arg1: i32, %arg2: memref<1xi32, #tpu.memory_space<smem>>) -> (i32, i32, i32) {
    %c0_i32 = arith.constant 0 : i32
    %c0_i32_0 = arith.constant 0 : i32
    return %arg1, %arg0, %c0_i32 : i32, i32, i32
  }
  func.func @transform_1(%arg0: i32, %arg1: i32, %arg2: memref<1xi32, #tpu.memory_space<smem>>) -> (i32, i32) {
    %c0_i32 = arith.constant 0 : i32
    %c0_i32_0 = arith.constant 0 : i32
    return %arg0, %c0_i32 : i32, i32
  }
  func.func @transform_2(%arg0: i32, %arg1: i32, %arg2: memref<1xi32, #tpu.memory_space<smem>>) -> (i32, i32, i32) {
    %c0_i32 = arith.constant 0 : i32
    %c0_i32_0 = arith.constant 0 : i32
    return %arg1, %arg0, %c0_i32 : i32, i32, i32
  }
}

</mosaic_0001>

<bundles_post_ra>
// kernel: tpu_custom_call.1
= control target key start
LH: loop header
LB: loop body
LE: loop exit
PB: predicated region body
PF: predicated region fallthrough
CT: control target
= control target key end

     0   :  { %s757_s0 = inlined_call_operand.<no memory space> [shape: s32[1], index: 0, kind: input, shape index: {}]   ;;  %s758_s1 = inlined_call_operand.hbm [shape: f32[2,4,128], index: 1, kind: input, shape index: {}]   ;;  %s759_s2 = inlined_call_operand.hbm [shape: f32[4,128], index: 2, kind: input, shape index: {}]   ;;  %s760_s3 = inlined_call_operand.hbm [shape: f32[2,4,128], index: 3, kind: output, shape index: {}]  }
   0x1   :  { %8 = sst [smem:[#allocation3]] %s757_s0 }
   0x2   :  { %9 = vsyncpa [#allocation5], 0 }
   0x3   :  { %11 = vsyncpa [#allocation5 + $0x1], 0 }
   0x4   :  { %12 = vsyncpa [#allocation8], 0 }
   0x5   :  { %13 = vsyncpa [#allocation6], 0 }
   0x6   :  { %15 = vsyncpa [#allocation6 + $0x1], 0  ;;  %s589_s14 = smov 0   ;;  %s591_s15 = smov 0  }
   0x7   :  { %s593_s16 = smov 0   ;;  %s595_s17 = smov 0  }
   0x8   :  { %s597_s18 = smov 0   ;;  %s599_s19 = smov 0  }
   0x9 LB: > { %s334_s0 = sadd.s32 4294967295, %s561_s19   ;;  %s335_s20 = sadd.s32 4294967294, %s561_s19   ;;  %s561_s19 = sphi %s599_s19, %s21_s19   ;;  %s557_s18 = sphi %s597_s18, %s777_s18   ;;  %s553_s17 = sphi %s595_s17, %s776_s17   ;;  %s549_s16 = sphi %s593_s16, %s775_s16   ;;  %s545_s15 = sphi %s591_s15, %s774_s15   ;;  %s541_s14 = sphi %s589_s14, %s773_s14  }
   0xa   : > { %p55_p0 = scmp.ne.s32.totalorder %s545_s15, %s541_s14  ;;  %p623_p1 = scmp.eq.s32.totalorder %s334_s0, 0 }
   0xb   : > { %p627_p2 = scmp.eq.s32.totalorder %s334_s0, 1  ;;  %p113_p3 = scmp.eq.s32.totalorder %s335_s20, 1 }
   0xc   : > { %p633_p4 = por %p623_p1, %p55_p0  ;;  %p336_p5 = scmp.ge.s32.totalorder %s561_s19, 1 }
   0xd   : > { %p638_p6 = por %p113_p3, %p55_p0  ;;  %p120_p7 = scmp.lt.s32.totalorder %s561_s19, 3 }
   0xe   : > { %s764_s23 = scalar_select %p633_p4, 1, 0 }
   0xf   : > { %s765_s24 = scalar_select %p638_p6, 1, 0 }
  0x10   : > { %p643_p8 = pnand %p336_p5, %p120_p7  ;;  %s563_s26 = smov [#allocation7]  }
  0x11   : > { %s135_s27 = sshll.u32 %s563_s26, 4  ;;  %s30_s29 = sadd.s32 1, %s557_s18  ;;  %s136_s27 = int_to_ptr.vmem [resolvable:$true] %s135_s27 }
  0x12   : > { %p358_p10 = pneg %p643_p8  ;;  %s42_s30 = sadd.s32 1, %s549_s16 }
  0x13   : > { %p31_p12 = scmp.ge.s32.totalorder %s30_s29, 2  ;;  %s434_s4 = scalar_lea.vmem %s136_s27, 64 }
  0x14   : > { %p652_p11 = pnand %p358_p10, %p623_p1  ;;  %p435_p0 = scmp.ne.s32.totalorder %s136_s27, %s434_s4 }
  0x15   : > { %p442_p7 = scmp.lt.s32.totalorder %s136_s27, %s136_s27  ;;  %p443_p6 = scmp.lt.s32.totalorder %s434_s4, %s434_s4 }
  0x16   : > { %p425_p13 = pneg %p652_p11 }
  0x17   : > { %p444_p9 = por %p443_p6, %p442_p7 }
  0x18   : > { %p437_p3 = pnand %p435_p0, %p425_p13 }
  0x1a   : > { %p438_p5 = pneg %p437_p3 }
  0x1c   : > { %p445_p4 = pnand %p444_p9, %p438_p5 }
  0x1e   : > { %448 = shalt.err (!%p445_p4)
}
  0x1f   : > { %361 = dma.hbm_to_vmem [thread:$0]  (!%p652_p11), %s759_s2, 64, %s136_s27, [#allocation8]  }
  0x20   : > { %s779_s29 = smov (%p31_p12, %s30_s29), 0  ;;  %p49_p6 = scmp.ne.s32.totalorder %s549_s16, %s545_s15 }
  0x21   : > { %p50_p4 = scmp.eq.s32.totalorder %s561_s19, 0  ;;  %s37_s7 = ssub.s32 %s557_s18, %s779_s29 }
  0x22   : > { %p371_p9 = scmp.lt.s32.totalorder %s561_s19, 2  ;;  %p40_p10 = scmp.eq.s32.totalorder %s37_s7, 0 }
  0x23   : > { %p51_p13 = por %p50_p4, %p49_p6  ;;  %p675_p0 = por %p627_p2, %p49_p6 }
  0x24   : > { %s146_s9 = sand.u32 1, %s549_s16   ;;  %s340_s12 = sshll.u32 %s557_s18, 6 }
  0x25   : > { %s681_s10 = scalar_select %p40_p10, %s549_s16, %s42_s30  }
  0x26   : > { %s339_s11 = sshll.u32 %s146_s9, 2  ;;  %s156_s20 = scalar_lea.hbm %s758_s1, %s340_s12 }
  0x27   : > { %s150_s26 = scalar_lea.vmem [#allocation4], %s339_s11  ;;  %p687_p11 = pnand %p371_p9, %p51_p13 }
  0x28   : > { %s158_s27 = sshll.u32 %s150_s26, 4  ;;  %s147_s22 = scalar_lea.sflag [#allocation5], %s146_s9  ;;  %s159_s27 = int_to_ptr.vmem [resolvable:$true] %s158_s27 }
  0x29   : > { %p451_p2 = pneg %p687_p11  ;;  %s462_s4 = scalar_lea.vmem %s159_s27, 64 }
  0x2a   : > { %p463_p12 = scmp.ne.s32.totalorder %s159_s27, %s462_s4  ;;  %s564_s30 = smov [#allocation4]  }
  0x2b   : > { %s467_s5 = sshll.u32 %s564_s30, 4  ;;  %s468_s5 = int_to_ptr.vmem [resolvable:$false] %s467_s5 }
  0x2c   : > { %p465_p3 = pnand %p463_p12, %p451_p2  ;;  %s469_s6 = scalar_lea.vmem %s468_s5, 128 }
  0x2d   : > { %p470_p7 = scmp.lt.s32.totalorder %s159_s27, %s468_s5  ;;  %p471_p6 = scmp.lt.s32.totalorder %s469_s6, %s462_s4 }
  0x2e   : > { %p466_p5 = pneg %p465_p3 }
  0x2f   : > { %p472_p4 = por %p471_p6, %p470_p7 }
  0x31   : > { %p473_p10 = pnand %p472_p4, %p466_p5 }
  0x33   : > { %476 = shalt.err (!%p473_p10)
}
  0x34   : > { %365 = dma.hbm_to_vmem [thread:$0]  (!%p687_p11), %s156_s20, 64, %s159_s27, %s147_s22  }
  0x35   : > { %167 = sbr.rel (%p643_p8) target bundleno = 104 (0x68), region = 28  ;;  %s698_s7 = sand.u32 (!%p643_p8), 1, %s545_s15  }
  0x36   : > { %s342_s9 = sshll.u32 (!%p643_p8), %s698_s7, 2  ;;  %s170_s11 = scalar_lea.sflag (!%p643_p8), [#allocation5], %s698_s7 }
  0x37   : > { %s173_s12 = scalar_lea.vmem (!%p643_p8), [#allocation4], %s342_s9  ;;  %p770_p9 = scmp.ne.s32.totalorder (!%p643_p8), %s764_s23, 0 }
  0x3a   : > { %528 = dma.done.wait (%p770_p9), %s170_s11, 64  }
  0x3b   : > { %530 = vsyncadd (%p770_p9), %s170_s11, 4294967232 }
  0x3c   : > { %532 = dma.done.wait (%p623_p1), [#allocation8], 64  }
  0x3d   : > { %534 = vsyncadd (%p623_p1), [#allocation8], 4294967232  ;;  %s345_s25 = sshll.u32 %s553_s17, 2  ;;  %v204_v0 = vlaneseq  ;;  %s212_s13 = sld [smem:[#allocation3]]  ;;  %v198_v12 = vld [vmem:[%s173_s12] sm:$0xf] }
  0x3e   : > { %v208_v1 = vstv %s345_s25  ;;  %v199_v13 = vld [vmem:[#allocation7] sm:$0xf]  ;;  %s197_s21 = scalar_lea.vmem [#allocation9], %s342_s9  ;;  %s347_s0 = sshll.u32 %s553_s17, 6 }
  0x3f   : > { %v205_v2 = vshrl.u32 %v204_v0, 7  ;;  %v207_v3 = vand.u32 127, %v204_v0  ;;  %v200_v16 = vadd.f32 %v199_v13, %v198_v12  ;;  %s242_s23 = sshll.u32 %s197_s21, 4  ;;  %s240_s27 = scalar_lea.hbm %s760_s3, %s347_s0  ;;  %s712_s23 = int_to_ptr.vmem [resolvable:$true] %s242_s23 }
  0x40   : > { %s228_s28 = scalar_lea.sflag [#allocation6], %s698_s7  ;;  %s477_s22 = scalar_lea.vmem %s712_s23, 64 }
  0x41   : > { %v209_v4 = vadd.s32 %v208_v1, %v205_v2  ;;  %v224_v19 = vmul.f32 1.1111112, %v200_v16  ;;  %p478_p1 = scmp.ne.s32.totalorder %s712_s23, %s477_s22  ;;  %s565_s17 = smov [#allocation9]  }
  0x42   : > { %s481_s4 = sshll.u32 %s565_s17, 4  ;;  %s482_s4 = int_to_ptr.vmem [resolvable:$false] %s481_s4 }
  0x43   : > { %v210_v5 = vmul.u32 128, %v209_v4  ;;  %v213_v6 = vstv %s212_s13  ;;  %p479_p8 = pnand %p478_p1, %p675_p0  ;;  %s483_s30 = scalar_lea.vmem %s482_s4, 128 }
  0x44   : > { %p484_p11 = scmp.lt.s32.totalorder %s712_s23, %s482_s4  ;;  %p485_p2 = scmp.lt.s32.totalorder %s483_s30, %s477_s22 }
  0x45   : > { %v211_v7 = vadd.s32 %v210_v5, %v207_v3  ;;  %p480_p13 = pneg %p479_p8 }
  0x46   : > { %p486_p12 = por %p485_p2, %p484_p11 }
  0x47   : > { %v214_v8 = vxor.u32 %v213_v6, %v211_v7 }
  0x48   : > { %p487_p3 = pnand %p486_p12, %p480_p13 }
  0x49   : > { %v215_v9 = vshrl.u32 %v214_v8, 16 }
  0x4b   : > { %v216_v10 = vxor.u32 %v215_v9, %v214_v8 }
  0x4d   : > { %v217_v11 = vmul.u32 2146121005, %v216_v10 }
  0x4f   : > { %v218_v14 = vshrl.u32 %v217_v11, 15 }
  0x51   : > { %v219_v15 = vxor.u32 %v218_v14, %v217_v11 }
  0x53   : > { %v220_v17 = vmul.u32 2221713035, %v219_v15 }
  0x55   : > { %v221_v18 = vshrl.u32 %v220_v17, 16 }
  0x57   : > { %v222_v20 = vxor.u32 %v221_v18, %v220_v17 }
  0x59   : > { %vm223_vm0 = vcmp.lt.u32.totalorder %v222_v20, 3865470566 }
  0x5a   : > { %v225_v21 = vsel %vm223_vm0, %v224_v19, 0.0 }
  0x5b   : > { %226 = vst [vmem:[%s197_s21] sm:$0xf] %v225_v21 }
  0x5c   : > { %490 = shalt.err (!%p487_p3)
}
  0x5d   : > { %s491_s5 = scalar_lea.hbm %s240_s27, 64  ;;  %s495_s9 = scalar_lea.hbm %s760_s3, 128 }
  0x5e   : > { %p492_p5 = scmp.ne.s32.totalorder %s240_s27, %s491_s5  ;;  %p496_p4 = scmp.lt.s32.totalorder %s240_s27, %s760_s3 }
  0x5f   : > { %p497_p10 = scmp.lt.s32.totalorder %s495_s9, %s491_s5 }
  0x60   : > { %p493_p7 = pnand %p492_p5, %p675_p0 }
  0x61   : > { %p498_p9 = por %p497_p10, %p496_p4 }
  0x62   : > { %p494_p6 = pneg %p493_p7 }
  0x64   : > { %p499_p1 = pnand %p498_p9, %p494_p6 }
  0x66   : > { %502 = shalt.err (!%p499_p1)
}
  0x67   : > { %356 = dma.vmem_to_hbm [thread:$0]  (%p675_p0), %s712_s23, 64, %s240_s27, %s228_s28  }
  0x68 PF: > { %s254_s25 = sand.u32 1, %s541_s14   ;;  %p771_p8 = scmp.ne.s32.totalorder %s765_s24, 0 }
  0x69   : > { %p772_p13 = scmp.ge.s32.totalorder %s561_s19, 2  ;;  %s255_s13 = scalar_lea.sflag [#allocation6], %s254_s25 }
  0x6b   : > { %p367_p11 = pnand %p772_p13, %p771_p8 }
  0x6d   : > { %p368_p2 = pneg %p367_p11 }
  0x6f   : > { %536 = dma.done.wait (%p368_p2), %s255_s13, 64  }
  0x70   : > { %538 = vsyncadd (%p368_p2), %s255_s13, 4294967232  ;;  %s21_s19 = sadd.s32 1, %s561_s19   ;;  %s773_s14 = smov %s545_s15 }
  0x71   : > { %p18_p12 = scmp.ge.s32.totalorder %s21_s19, 4   ;;  %s774_s15 = smov %s549_s16 }
  0x72   : > { %s775_s16 = smov %s681_s10  ;;  %s776_s17 = smov %s557_s18 }
  0x73   : > { %s777_s18 = smov %s779_s29  ;;  %20 = sbr.rel (!%p18_p12) target bundleno = 9 (0x9), region = 78 }
  0x78   :  { %260 = vsyncpa [#allocation5], 1 }
  0x79   :  { %262 = vsyncpa [#allocation5 + $0x1], 1 }
  0x7a   :  { %263 = vsyncpa [#allocation8], 1 }
  0x7b   :  { %264 = vsyncpa [#allocation6], 1 }
  0x7c   :  { %266 = vsyncpa [#allocation6 + $0x1], 1 }

</bundles_post_ra>
